<compile_context>
chip_gen: v7x
topology: tpu7x:2x2x1
jax: 0.10.0
libtpu: 0.0.40
codegen_flags: <defaults>
</compile_context>

<pallas_src>
import functools
import math

import jax
import jax.numpy as jnp
from jax.experimental import pallas as pl
from jax.experimental.pallas import tpu as pltpu


# ---------------------------------------------------------------------------
# Path A: fused, VMEM-resident, block-diagonal (used when S*F is small).
# ---------------------------------------------------------------------------
def _mapping_fused_kernel(negative_slope, n_layers, x_ref, w_ref, b_ref, o_ref):
    """Whole network in one kernel invocation (no grid).

    x_ref: (B, S, F)      input z
    w_ref: (L, S*F, S*F)  block-diagonal per-layer weights, MXU-native (K, O) layout,
                          equalization constant c already folded in
    b_ref: (L, 1, S*F)    per-layer bias rows, tiled across style blocks
    o_ref: (B, S*F)       lane-dense output slab
    """
    B, S, F = x_ref.shape
    sf = S * F

    # F.normalize(z, dim=2): rsqrt of the squared norm (EUP) + multiply (VPU).
    z = x_ref[...].astype(jnp.float32)                         # (B, S, F)
    ssum = jnp.sum(z * z, axis=-1, keepdims=True)               # (B, S, 1)
    z = z * jax.lax.rsqrt(jnp.maximum(ssum, 1e-24))             # == z / max(|z|, 1e-12)
    x = z.reshape(B, sf)                                        # one-time lane-dense relayout

    needs_cast = w_ref.dtype != jnp.float32                     # cast only at the MXU feed

    # Fully unrolled layer loop (equivalent to lax.fori_loop(..., unroll=True) here):
    # static slices of the resident weight stack, cross-layer scheduling visibility.
    for l in range(n_layers):
        w = w_ref[l]                                            # (S*F, S*F), static slice
        x_mm = x.astype(w_ref.dtype) if needs_cast else x
        h = jnp.dot(x_mm, w, preferred_element_type=jnp.float32)  # one wide MXU matmul
        h = h + b_ref[l].astype(jnp.float32)                    # (1, S*F) broadcast
        x = jnp.where(h >= 0, h, negative_slope * h)            # LeakyReLU(0.2), f32

    o_ref[...] = x.astype(o_ref.dtype)


def _mapping_fused(z, w_ko, biases, negative_slope):
    B, S, F = z.shape
    L = w_ko.shape[0]
    sf = S * F

    # Block-diagonal packing (one-time param transform; in a real model the params
    # would be stored like this):  W_bd[l, s*F + k, s*F + o] = c * W[l, s, o, k].
    eye_s = jnp.eye(S, dtype=w_ko.dtype)
    w_bd = jnp.einsum("lsko,st->lskto", w_ko, eye_s).reshape(L, sf, sf)
    b_bd = jnp.tile(biases, (1, S)).reshape(L, 1, sf)           # bias per style block

    w_bytes = jnp.dtype(w_bd.dtype).itemsize
    z_bytes = jnp.dtype(z.dtype).itemsize
    need = (L * sf * sf * w_bytes           # resident block-diagonal weight stack
            + L * sf * 4                    # bias rows
            + B * sf * (2 * z_bytes + 4))   # input + output + f32 working activation
    # Cap well under v7x's 64 MiB physical VMEM; floor at the 32 MiB default.
    vmem_limit = int(min(48 * 2**20, max(32 * 2**20, 2 * need)))

    kernel = functools.partial(_mapping_fused_kernel, negative_slope, L)

    out_flat = pl.pallas_call(
        kernel,
        out_shape=jax.ShapeDtypeStruct((B, sf), z.dtype),
        in_specs=[
            pl.BlockSpec(memory_space=pltpu.MemorySpace.VMEM),  # z, whole array resident
            pl.BlockSpec(memory_space=pltpu.MemorySpace.VMEM),  # all layer weights resident
            pl.BlockSpec(memory_space=pltpu.MemorySpace.VMEM),  # all biases resident
        ],
        out_specs=pl.BlockSpec(memory_space=pltpu.MemorySpace.VMEM),
        compiler_params=pltpu.CompilerParams(vmem_limit_bytes=vmem_limit),
    )(z, w_bd, b_bd)
    return out_flat.reshape(B, S, F)                            # free wrapper reshape


# ---------------------------------------------------------------------------
# Path B: streaming over layers (used when S*F is too large for block-diagonal).
# ---------------------------------------------------------------------------
def _mapping_stream_kernel(negative_slope, x_ref, w_ref, b_ref, o_ref, act_ref):
    """One grid step == one EqualizedLinear + LeakyReLU layer (all styles at once).

    x_ref:   (B, S, F)  input z (constant block index -> DMA'd once)
    w_ref:   (S, K, O)  this layer's per-style weights (c folded in, MXU (K, O) layout)
    b_ref:   (1, O)     this layer's bias row
    o_ref:   (B, S, O)  final output (VMEM-resident, written at the last layer)
    act_ref: (S, B, O)  f32 activation carried across layers (style-major)
    """
    layer = pl.program_id(0)
    n_layers = pl.num_programs(0)

    @pl.when(layer == 0)
    def _():
        z = x_ref[...].astype(jnp.float32)                      # (B, S, F)
        ssum = jnp.sum(z * z, axis=-1, keepdims=True)
        z = z * jax.lax.rsqrt(jnp.maximum(ssum, 1e-24))
        act_ref[...] = pltpu.einshape("bsf->sbf", z)            # (S, B, F)

    x_in = act_ref[...]                                         # (S, B, K) f32
    w = w_ref[...]                                              # (S, K, O), native dtype
    x_mm = x_in.astype(w.dtype) if w.dtype != jnp.float32 else x_in
    h = jnp.einsum("sbk,sko->sbo", x_mm, w, preferred_element_type=jnp.float32)
    h = h + b_ref[...].astype(jnp.float32)                      # (1, O) broadcast
    h = jnp.where(h >= 0, h, negative_slope * h)                # LeakyReLU(0.2)
    act_ref[...] = h

    @pl.when(layer == n_layers - 1)
    def _():
        o_ref[...] = pltpu.einshape("sbf->bsf", act_ref[...]).astype(o_ref.dtype)


def _mapping_streaming(z, w_ko, biases, negative_slope):
    B, S, F = z.shape
    L, _, K, O = w_ko.shape
    b_row = biases.reshape(L, 1, O)

    kernel = functools.partial(_mapping_stream_kernel, negative_slope)

    w_bytes = jnp.dtype(w_ko.dtype).itemsize
    z_bytes = jnp.dtype(z.dtype).itemsize
    vmem_need = (2 * S * K * O * w_bytes      # double-buffered streamed weight tile
                 + B * S * K * z_bytes        # input block (constant index -> single copy)
                 + B * S * O * z_bytes        # output block
                 + S * B * O * 4              # f32 activation scratch
                 + 2 * O * w_bytes)           # bias
    # Cap at 48 MiB (headroom under v7x's 64 MiB physical VMEM); floor at 32 MiB.
    vmem_limit = int(min(48 * 2**20, max(32 * 2**20, 2 * vmem_need)))

    return pl.pallas_call(
        kernel,
        out_shape=jax.ShapeDtypeStruct((B, S, O), z.dtype),
        grid_spec=pltpu.PrefetchScalarGridSpec(
            num_scalar_prefetch=0,
            grid=(L,),                                          # one step per layer
            in_specs=[
                # z: constant block index -> fetched once, stays resident in VMEM.
                pl.BlockSpec((B, S, K), lambda l: (0, 0, 0)),
                # Layer-l per-style weight stack: streamed (double-buffered) each step.
                pl.BlockSpec((None, S, K, O), lambda l: (l, 0, 0, 0)),
                # Layer-l bias row.
                pl.BlockSpec((None, 1, O), lambda l: (l, 0, 0)),
            ],
            # Constant block index -> output stays in VMEM, written back to HBM once.
            out_specs=pl.BlockSpec((B, S, O), lambda l: (0, 0, 0)),
            scratch_shapes=[pltpu.VMEM((S, B, O), jnp.float32)],
        ),
        compiler_params=pltpu.CompilerParams(
            # Layer l+1 consumes layer l's activation -> the layer axis is sequential.
            dimension_semantics=("arbitrary",),
            vmem_limit_bytes=vmem_limit,
        ),
    )(z, w_ko, b_row)


# ---------------------------------------------------------------------------
# Public wrapper.
# ---------------------------------------------------------------------------
def mapping_network(z, weights, biases, *, negative_slope=0.2, force_streaming=False):
    """Fused MappingNetwork forward.

    z:       (B, S, F)
    weights: (n_layers, S, F, F) in PyTorch F.linear layout per style, i.e.
             weights[l, s] has shape (out_features, in_features) = (O, K).
    biases:  (n_layers, F)
    returns  (B, S, F)
    """
    B, S, F = z.shape
    L, S_w, O, K = weights.shape
    assert S_w == S, "Input style dimension does not match weight matrix count."
    assert K == F and O == F, "MappingNetwork layers are (features -> features)."
    assert biases.shape == (L, O)

    # Param-prep (one-time transform in a real model): fold the equalization constant
    # c = 1/sqrt(K) into the weights and transpose to the MXU-native (K, O) layout so
    # the kernels never scale or transpose the big weight tiles per step.
    c = 1.0 / math.sqrt(K)
    w_ko = jnp.swapaxes(weights, -1, -2) * jnp.asarray(c, weights.dtype)  # (L, S, K, O)

    sf = S * F
    bd_bytes = L * sf * sf * jnp.dtype(weights.dtype).itemsize
    use_fused = ((not force_streaming) and sf <= 512 and L <= 32
                 and bd_bytes <= 16 * 2**20)

    if use_fused:
        return _mapping_fused(z, w_ko, biases, negative_slope)
    return _mapping_streaming(z, w_ko, biases, negative_slope)


if __name__ == "__main__":
    # Small shapes consistent with MappingNetwork(features, n_layers, style_dim).
    batch, style_dim, features, n_layers = 2, 4, 32, 3
    negative_slope = 0.2

    key = jax.random.PRNGKey(0)
    kz, kw, kb = jax.random.split(key, 3)

    z = jax.random.normal(kz, (batch, style_dim, features), dtype=jnp.float32)
    # EqualizedWeight init: randn(style_dim, out, in) * 0.01, one stack per layer.
    weights = jax.random.normal(
        kw, (n_layers, style_dim, features, features), dtype=jnp.float32) * 0.01
    # Non-zero biases so the bias broadcast path is actually exercised.
    biases = 0.1 * jax.random.normal(kb, (n_layers, features), dtype=jnp.float32)

    # Pure-JAX reference mirroring the PyTorch module.
    c = 1.0 / math.sqrt(features)
    nrm = jnp.sqrt(jnp.sum(z * z, axis=-1, keepdims=True))
    ref = z / jnp.maximum(nrm, 1e-12)
    for l in range(n_layers):
        ref = jnp.einsum("bsk,sok->bso", ref, weights[l] * c) + biases[l]
        ref = jnp.where(ref >= 0, ref, negative_slope * ref)

    # Primary path: fused / block-diagonal / VMEM-resident (S*F = 128 here).
    out = mapping_network(z, weights, biases, negative_slope=negative_slope)
    out = jax.block_until_ready(out)
    assert out.shape == (batch, style_dim, features)
    assert jnp.allclose(out, ref, atol=1e-5, rtol=1e-5), "fused kernel mismatch vs reference"

    # Fallback streaming path (used for large S*F, e.g. StyleGAN S=18, F=512):
    # exercise it too so both code paths are validated.
    out_s = mapping_network(z, weights, biases, negative_slope=negative_slope,
                            force_streaming=True)
    out_s = jax.block_until_ready(out_s)
    assert jnp.allclose(out_s, ref, atol=1e-5, rtol=1e-5), \
        "streaming kernel mismatch vs reference"

    print("KERNEL_OK")
</pallas_src>

<mosaic_0001>
module attributes {stable_mosaic.version = 11 : i64} {
  func.func @_mapping_fused_kernel(%arg0: memref<2x4x32xf32, #tpu.memory_space<vmem>>, %arg1: memref<3x128x128xf32, #tpu.memory_space<vmem>>, %arg2: memref<3x1x128xf32, #tpu.memory_space<vmem>>, %arg3: memref<2x128xf32, #tpu.memory_space<vmem>>) attributes {dimension_semantics = [], scalar_prefetch = 0 : i64, scratch_operands = 0 : i64, tpu.core_type = #tpu.core_type<tc>} {
    %c0 = arith.constant 0 : index
    %c0_0 = arith.constant 0 : index
    %c0_1 = arith.constant 0 : index
    %0 = vector.load %arg0[%c0, %c0_0, %c0_1] : memref<2x4x32xf32, #tpu.memory_space<vmem>>, vector<2x4x32xf32>
    %1 = arith.mulf %0, %0 : vector<2x4x32xf32>
    %cst = arith.constant dense<0.000000e+00> : vector<2x4xf32>
    %2 = vector.multi_reduction <add>, %1, %cst [2] : vector<2x4x32xf32> to vector<2x4xf32>
    %3 = vector.shape_cast %2 : vector<2x4xf32> to vector<2x4x1xf32>
    %cst_2 = arith.constant 1.000000e-24 : f32
    %4 = vector.broadcast %cst_2 : f32 to vector<2x4x1xf32>
    %5 = arith.maximumf %3, %4 : vector<2x4x1xf32>
    %6 = math.rsqrt %5 : vector<2x4x1xf32>
    %7 = vector.broadcast %6 : vector<2x4x1xf32> to vector<2x4x32xf32>
    %8 = arith.mulf %0, %7 : vector<2x4x32xf32>
    %9 = vector.shape_cast %8 : vector<2x4x32xf32> to vector<2x128xf32>
    %c0_3 = arith.constant 0 : index
    %c0_4 = arith.constant 0 : index
    %c0_5 = arith.constant 0 : index
    %10 = vector.load %arg1[%c0_3, %c0_4, %c0_5] : memref<3x128x128xf32, #tpu.memory_space<vmem>>, vector<1x128x128xf32>
    %11 = vector.shape_cast %10 : vector<1x128x128xf32> to vector<128x128xf32>
    %cst_6 = arith.constant dense<0.000000e+00> : vector<2x128xf32>
    %12 = tpu.matmul %9, %11, %cst_6 {dimension_numbers = #tpu.dot_dimension_numbers<[1], [0], [0], [1], [0, 0, 1, 1], [], []>} : vector<2x128xf32>, vector<128x128xf32>, vector<2x128xf32> -> vector<2x128xf32>
    %c0_7 = arith.constant 0 : index
    %c0_8 = arith.constant 0 : index
    %c0_9 = arith.constant 0 : index
    %13 = vector.load %arg2[%c0_7, %c0_8, %c0_9] : memref<3x1x128xf32, #tpu.memory_space<vmem>>, vector<1x1x128xf32>
    %14 = vector.shape_cast %13 : vector<1x1x128xf32> to vector<1x128xf32>
    %15 = vector.broadcast %14 : vector<1x128xf32> to vector<2x128xf32>
    %16 = arith.addf %12, %15 : vector<2x128xf32>
    %cst_10 = arith.constant 0.000000e+00 : f32
    %17 = vector.broadcast %cst_10 : f32 to vector<2x128xf32>
    %18 = arith.cmpf oge, %16, %17 : vector<2x128xf32>
    %cst_11 = arith.constant 2.000000e-01 : f32
    %19 = vector.broadcast %cst_11 : f32 to vector<2x128xf32>
    %20 = arith.mulf %19, %16 : vector<2x128xf32>
    %21 = arith.select %18, %16, %20 : vector<2x128xi1>, vector<2x128xf32>
    %c1 = arith.constant 1 : index
    %c0_12 = arith.constant 0 : index
    %c0_13 = arith.constant 0 : index
    %22 = vector.load %arg1[%c1, %c0_12, %c0_13] : memref<3x128x128xf32, #tpu.memory_space<vmem>>, vector<1x128x128xf32>
    %23 = vector.shape_cast %22 : vector<1x128x128xf32> to vector<128x128xf32>
    %cst_14 = arith.constant dense<0.000000e+00> : vector<2x128xf32>
    %24 = tpu.matmul %21, %23, %cst_14 {dimension_numbers = #tpu.dot_dimension_numbers<[1], [0], [0], [1], [0, 0, 1, 1], [], []>} : vector<2x128xf32>, vector<128x128xf32>, vector<2x128xf32> -> vector<2x128xf32>
    %c1_15 = arith.constant 1 : index
    %c0_16 = arith.constant 0 : index
    %c0_17 = arith.constant 0 : index
    %25 = vector.load %arg2[%c1_15, %c0_16, %c0_17] : memref<3x1x128xf32, #tpu.memory_space<vmem>>, vector<1x1x128xf32>
    %26 = vector.shape_cast %25 : vector<1x1x128xf32> to vector<1x128xf32>
    %27 = vector.broadcast %26 : vector<1x128xf32> to vector<2x128xf32>
    %28 = arith.addf %24, %27 : vector<2x128xf32>
    %cst_18 = arith.constant 0.000000e+00 : f32
    %29 = vector.broadcast %cst_18 : f32 to vector<2x128xf32>
    %30 = arith.cmpf oge, %28, %29 : vector<2x128xf32>
    %cst_19 = arith.constant 2.000000e-01 : f32
    %31 = vector.broadcast %cst_19 : f32 to vector<2x128xf32>
    %32 = arith.mulf %31, %28 : vector<2x128xf32>
    %33 = arith.select %30, %28, %32 : vector<2x128xi1>, vector<2x128xf32>
    %c2 = arith.constant 2 : index
    %c0_20 = arith.constant 0 : index
    %c0_21 = arith.constant 0 : index
    %34 = vector.load %arg1[%c2, %c0_20, %c0_21] : memref<3x128x128xf32, #tpu.memory_space<vmem>>, vector<1x128x128xf32>
    %35 = vector.shape_cast %34 : vector<1x128x128xf32> to vector<128x128xf32>
    %cst_22 = arith.constant dense<0.000000e+00> : vector<2x128xf32>
    %36 = tpu.matmul %33, %35, %cst_22 {dimension_numbers = #tpu.dot_dimension_numbers<[1], [0], [0], [1], [0, 0, 1, 1], [], []>} : vector<2x128xf32>, vector<128x128xf32>, vector<2x128xf32> -> vector<2x128xf32>
    %c2_23 = arith.constant 2 : index
    %c0_24 = arith.constant 0 : index
    %c0_25 = arith.constant 0 : index
    %37 = vector.load %arg2[%c2_23, %c0_24, %c0_25] : memref<3x1x128xf32, #tpu.memory_space<vmem>>, vector<1x1x128xf32>
    %38 = vector.shape_cast %37 : vector<1x1x128xf32> to vector<1x128xf32>
    %39 = vector.broadcast %38 : vector<1x128xf32> to vector<2x128xf32>
    %40 = arith.addf %36, %39 : vector<2x128xf32>
    %cst_26 = arith.constant 0.000000e+00 : f32
    %41 = vector.broadcast %cst_26 : f32 to vector<2x128xf32>
    %42 = arith.cmpf oge, %40, %41 : vector<2x128xf32>
    %cst_27 = arith.constant 2.000000e-01 : f32
    %43 = vector.broadcast %cst_27 : f32 to vector<2x128xf32>
    %44 = arith.mulf %43, %40 : vector<2x128xf32>
    %45 = arith.select %42, %40, %44 : vector<2x128xi1>, vector<2x128xf32>
    %c0_28 = arith.constant 0 : index
    %c0_29 = arith.constant 0 : index
    %46 = vector.load %arg3[%c0_28, %c0_29] : memref<2x128xf32, #tpu.memory_space<vmem>>, vector<2x128xf32>
    tpu.vector_store %arg3[%c0_28, %c0_29], %45 {strides = array<i32>} : memref<2x128xf32, #tpu.memory_space<vmem>>, vector<2x128xf32>,
    return
  }
}

</mosaic_0001>

<bundles_post_ra>
// kernel: tpu_custom_call.1
= control target key start
LH: loop header
LB: loop body
LE: loop exit
PB: predicated region body
PF: predicated region fallthrough
CT: control target
= control target key end

     0   :  { %8 = vsyncpa [#allocation3], 0  ;;  %s861_s0 = inlined_call_operand.hbm [shape: f32[2,4,32], index: 0, kind: input, shape index: {}]   ;;  %s862_s1 = inlined_call_operand.hbm [shape: f32[3,128,128], index: 1, kind: input, shape index: {}]   ;;  %s863_s2 = inlined_call_operand.vmem [shape: f32[3,1,128], index: 2, kind: input, shape index: {}]   ;;  %s864_s3 = inlined_call_operand.hbm [shape: f32[2,128], index: 3, kind: output, shape index: {}]  }
   0x1   :  { %9 = vsyncpa [#allocation6], 0 }
   0x2   :  { %10 = vsyncpa [#allocation4], 0  ;;  %s742_s12 = smov [#allocation2]   ;;  %s670_s16 = scalar_lea.hbm %s861_s0, 128 }
   0x3   :  { %s16_s13 = sshll.u32 %s742_s12, 4  ;;  %p671_p0 = scmp.ne.s32.totalorder %s861_s0, %s670_s16  ;;  %s17_s13 = int_to_ptr.vmem [resolvable:$true] %s16_s13 }
   0x4   :  { %p674_p1 = scmp.lt.u32.totalorder %s670_s16, %s861_s0 }
   0x6   :  { %p676_p2 = pnand %p674_p1, %p671_p0 }
   0x8   :  { %679 = shalt.err (!%p676_p2)
}
   0x9   :  { %s680_s21 = scalar_lea.vmem %s17_s13, 128  ;;  %p685_p4 = scmp.lt.s32.totalorder %s17_s13, %s17_s13 }
   0xa   :  { %p681_p3 = scmp.ne.s32.totalorder %s17_s13, %s680_s21  ;;  %p686_p5 = scmp.lt.s32.totalorder %s680_s21, %s680_s21 }
   0xc   :  { %p687_p6 = por %p686_p5, %p685_p4 }
   0xe   :  { %p688_p7 = pnand %p687_p6, %p681_p3 }
  0x10   :  { %691 = shalt.err (!%p688_p7)
}
  0x11   :  { %s743_s22 = smov 64   ;;  %s744_s23 = smov 4  }
  0x12   :  { %22 = dma.hbm_to_vmem [thread:$0]  %s861_s0, 128, %s17_s13, [#allocation3], %s743_s22, %s743_s22, %s744_s23  }
  0x13   :  { %s745_s26 = smov [#allocation5]   ;;  %s692_s30 = scalar_lea.hbm %s862_s1, 6144 }
  0x14   :  { %s28_s27 = sshll.u32 %s745_s26, 4  ;;  %p693_p8 = scmp.ne.s32.totalorder %s862_s1, %s692_s30  ;;  %s29_s27 = int_to_ptr.vmem [resolvable:$true] %s28_s27 }
  0x15   :  { %p696_p9 = scmp.lt.u32.totalorder %s692_s30, %s862_s1 }
  0x17   :  { %p698_p10 = pnand %p696_p9, %p693_p8 }
  0x19   :  { %701 = shalt.err (!%p698_p10)
}
  0x1a   :  { %s702_s8 = scalar_lea.vmem %s29_s27, 6144  ;;  %p707_p12 = scmp.lt.s32.totalorder %s29_s27, %s29_s27 }
  0x1b   :  { %p703_p11 = scmp.ne.s32.totalorder %s29_s27, %s702_s8  ;;  %p708_p13 = scmp.lt.s32.totalorder %s702_s8, %s702_s8 }
  0x1d   :  { %p709_p0 = por %p708_p13, %p707_p12 }
  0x1f   :  { %p710_p1 = pnand %p709_p0, %p703_p11 }
  0x21   :  { %713 = shalt.err (!%p710_p1)
}
  0x22   :  { %s746_s0 = smov 128   ;;  %s747_s9 = smov 8  }
  0x23   :  { %34 = dma.hbm_to_vmem [thread:$0]  %s862_s1, 6144, %s29_s27, [#allocation6], %s746_s0, %s746_s0, %s747_s9  }
  0x24   :  { %736 = dma.done.wait [#allocation3], 128  }
  0x25   :  { %737 = vsyncadd [#allocation3], 4294967168 }
  0x26   :  { %738 = dma.done.wait [#allocation6], 6144  }
  0x27   :  { %739 = vsyncadd [#allocation6], 4294961152  ;;  %v802_v0 = vld [vmem:[#allocation2] sm:$0xf]  ;;  %vm47_vm0 = vcmask 257024   ;;  %v110_v6 = vld [vmem:[#allocation5] sm:$0xff]  ;;  %v62_v34 = vlaneseq }
  0x28   :  { %v804_v1 = vld [vmem:[#allocation2 + $0x4] sm:$0xf]  ;;  %v45_v2 = vmul.f32 %v802_v0, %v802_v0  ;;  %v111_v7 = vld [vmem:[#allocation5 + $0x8] sm:$0xff]  ;;  %v112_v8 = vld [vmem:[#allocation5 + $0x10] sm:$0xff]  ;;  %v748_v9 = vmov 0.0|0.0   ;;  %vm751_vm1 = vmmov 0  }
  0x29   :  { %v46_v3 = vmul.f32 %v804_v1, %v804_v1  ;;  %580 = vmatprep.subr.bf16.mxu0 %v748_v9  ;;  %v581_v10 = vpack.c.bf16 %v111_v7, %v110_v6  ;;  %v113_v11 = vld [vmem:[#allocation5 + $0x18] sm:$0xff]  ;;  %604 = vmatprep.subr.bf16.mxu1 %v748_v9  ;;  %v114_v13 = vld [vmem:[#allocation5 + $0x20] sm:$0xff]  ;;  %v115_v14 = vld [vmem:[#allocation5 + $0x28] sm:$0xff]  ;;  %v749_v32 = vmov 1983009808   ;;  %v63_v36 = vshrl.u32 %v62_v34, 7 }
  0x2a   :  { %v48_v4 = vsel %vm47_vm0, %v45_v2, 0.0  ;;  %v584_v12 = vpack.c.bf16 %v113_v11, %v112_v8  ;;  %v587_v15 = vpack.c.bf16 %v115_v14, %v114_v13  ;;  %v116_v16 = vld [vmem:[#allocation5 + $0x30] sm:$0xff]  ;;  %v117_v17 = vld [vmem:[#allocation5 + $0x38] sm:$0xff]  ;;  %v118_v19 = vld [vmem:[#allocation5 + $0x40] sm:$0xff]  ;;  %v60_v33 = vunpack.c.l.s4 %v749_v32  ;;  %s753_s1 = smov 96   ;;  %s754_s12 = smov 32  }
  0x2b   :  { %49 = vadd.xlane.f32.xlu0 %v48_v4  ;;  %v51_v5 = vsel %vm47_vm0, %v46_v3, 0.0  ;;  %582 = vmatpush3.bf16.msra.mxu0 %v581_v10  ;;  %v590_v18 = vpack.c.bf16 %v117_v17, %v116_v16  ;;  %v119_v20 = vld [vmem:[#allocation5 + $0x48] sm:$0xff]  ;;  %v120_v22 = vld [vmem:[#allocation5 + $0x50] sm:$0xff]  ;;  %v121_v23 = vld [vmem:[#allocation5 + $0x58] sm:$0xff]  ;;  %v750_v37 = vmov 1934713408  }
  0x2c   :  { %583 = vmatprep.subr.bf16.mxu0 %v748_v9  ;;  %v593_v21 = vpack.c.bf16 %v119_v20, %v118_v19  ;;  %v596_v24 = vpack.c.bf16 %v121_v23, %v120_v22  ;;  %v122_v25 = vld [vmem:[#allocation5 + $0x60] sm:$0xff]  ;;  %v123_v26 = vld [vmem:[#allocation5 + $0x68] sm:$0xff]  ;;  %v61_v35 = vunpack.c.0.s8 %v60_v33  ;;  %v77_v38 = vunpack.c.l.s4 %v750_v37  ;;  %v124_v40 = vld [vmem:[#allocation5 + $0x70] sm:$0xff]  ;;  %s755_s19 = smov [#allocation7]  }
  0x2d   :  { %v599_v27 = vpack.c.bf16 %v123_v26, %v122_v25  ;;  %v125_v41 = vld [vmem:[#allocation5 + $0x78] sm:$0xff]  ;;  %v752_v51 = vmov 0.0   ;;  %v207_v52 = vld [vmem:[#allocation5 + $0x80] sm:$0xff]  ;;  %v208_v53 = vld [vmem:[#allocation5 + $0x88] sm:$0xff]  ;;  %vm104_vm2 = vcmask 261120   ;;  %vm106_vm3 = vcmask 523264  }
  0x2e   :  { %v64_v43 = vsub.s32 %v61_v35, %v63_v36  ;;  %v78_v44 = vunpack.c.0.s8 %v77_v38  ;;  %v602_v45 = vpack.c.bf16 %v125_v41, %v124_v40  ;;  %507 = vmatprep.mubr.msk.f32.mxu0 %vm751_vm1, %v752_v51  ;;  %542 = vmatprep.mubr.msk.f32.mxu1 %vm751_vm1, %v752_v51  ;;  %v605_v56 = vpack.c.bf16 %v208_v53, %v207_v52  ;;  %v209_v57 = vld [vmem:[#allocation5 + $0x90] sm:$0xff]  ;;  %v210_v58 = vld [vmem:[#allocation5 + $0x98] sm:$0xff]  ;;  %v215_v6 = vld [vmem:[#allocation5 + $0xc0] sm:$0xff]  ;;  %s409_s20 = sshll.u32 %s755_s19, 4  ;;  %s410_s20 = int_to_ptr.vmem [resolvable:$true] %s409_s20 }
  0x2f   :  { %52 = vadd.xlane.f32.xlu0 %v51_v5  ;;  %585 = vmatpush3.bf16.msra.mxu0 %v584_v12  ;;  %v608_v61 = vpack.c.bf16 %v210_v58, %v209_v57  ;;  %v213_v3 = vld [vmem:[#allocation5 + $0xb0] sm:$0xff]  ;;  %v214_v4 = vld [vmem:[#allocation5 + $0xb8] sm:$0xff]  ;;  %v216_v7 = vld [vmem:[#allocation5 + $0xc8] sm:$0xff]  ;;  %vm108_vm4 = vcmask 785408   ;;  %s714_s21 = scalar_lea.vmem %s410_s20, 32  ;;  %p719_p3 = scmp.lt.s32.totalorder %s410_s20, %s410_s20 }
  0x30   :  { %586 = vmatprep.subr.bf16.mxu0 %v748_v9  ;;  %v81_v50 = vsub.s32 %v78_v44, %v63_v36  ;;  %606 = vmatpush3.bf16.msra.mxu1 %v605_v56  ;;  %v614_v5 = vpack.c.bf16 %v214_v4, %v213_v3  ;;  %v617_v8 = vpack.c.bf16 %v216_v7, %v215_v6  ;;  %v217_v10 = vld [vmem:[#allocation5 + $0xd0] sm:$0xff]  ;;  %v218_v11 = vld [vmem:[#allocation5 + $0xd8] sm:$0xff]  ;;  %v219_v13 = vld [vmem:[#allocation5 + $0xe0] sm:$0xff]  ;;  %p715_p2 = scmp.ne.s32.totalorder %s410_s20, %s714_s21  ;;  %p720_p4 = scmp.lt.s32.totalorder %s714_s21, %s714_s21 }
  0x31   :  { %607 = vmatprep.subr.bf16.mxu1 %v748_v9  ;;  %v620_v12 = vpack.c.bf16 %v218_v11, %v217_v10  ;;  %v220_v14 = vld [vmem:[#allocation5 + $0xe8] sm:$0xff]  ;;  %v221_v22 = vld [vmem:[#allocation5 + $0xf0] sm:$0xff]  ;;  %v222_v23 = vld [vmem:[#allocation5 + $0xf8] sm:$0xff] }
  0x32   :  { %v305_v25 = vld [vmem:[#allocation5 + $0x100] sm:$0xff]  ;;  %v306_v26 = vld [vmem:[#allocation5 + $0x108] sm:$0xff]  ;;  %v311_v34 = vld [vmem:[#allocation5 + $0x130] sm:$0xff]  ;;  %p721_p5 = por %p720_p4, %p719_p3 }
  0x33   :  { %588 = vmatpush3.bf16.msra.mxu0 %v587_v15  ;;  %v623_v15 = vpack.c.bf16 %v220_v14, %v219_v13  ;;  %v310_v32 = vld [vmem:[#allocation5 + $0x128] sm:$0xff]  ;;  %v312_v35 = vld [vmem:[#allocation5 + $0x138] sm:$0xff]  ;;  %v313_v37 = vld [vmem:[#allocation5 + $0x140] sm:$0xff] }
  0x34   :  { %589 = vmatprep.subr.bf16.mxu0 %v748_v9  ;;  %609 = vmatpush3.bf16.msra.mxu1 %v608_v61  ;;  %v638_v36 = vpack.c.bf16 %v312_v35, %v311_v34  ;;  %v314_v38 = vld [vmem:[#allocation5 + $0x148] sm:$0xff]  ;;  %v315_v40 = vld [vmem:[#allocation5 + $0x150] sm:$0xff]  ;;  %v316_v41 = vld [vmem:[#allocation5 + $0x158] sm:$0xff]  ;;  %p722_p6 = pnand %p721_p5, %p715_p2 }
  0x35   :  { %610 = vmatprep.subr.bf16.mxu1 %v748_v9  ;;  %v318_v44 = vld [vmem:[#allocation5 + $0x168] sm:$0xff]  ;;  %v319_v52 = vld [vmem:[#allocation5 + $0x170] sm:$0xff]  ;;  %v320_v53 = vld [vmem:[#allocation5 + $0x178] sm:$0xff] }
  0x37   :  { %591 = vmatpush3.bf16.msra.mxu0 %v590_v18 }
  0x38   :  { %592 = vmatprep.subr.bf16.mxu0 %v748_v9 }
  0x3b   :  { %594 = vmatpush3.bf16.msra.mxu0 %v593_v21 }
  0x3c   :  { %595 = vmatprep.subr.bf16.mxu0 %v748_v9 }
  0x3f   :  { %597 = vmatpush3.bf16.msra.mxu0 %v596_v24  ;;  %v626_v24 = vpack.c.bf16 %v222_v23, %v221_v22 }
  0x40   :  { %598 = vmatprep.subr.bf16.mxu0 %v748_v9 }
  0x43   :  { %600 = vmatpush3.bf16.msra.mxu0 %v599_v27  ;;  %v307_v27 = vld [vmem:[#allocation5 + $0x110] sm:$0xff] }
  0x44   :  { %601 = vmatprep.subr.bf16.mxu0 %v748_v9 }
  0x47   :  { %603 = vmatpush3.bf16.msra.mxu0 %v602_v45 }
  0x48   :  { %628 = vmatprep.subr.bf16.mxu0 %v748_v9 }
  0xb8   :  { %v50_v28 = vpop.xlane.xlu0 %49 }
  0xb9   :  { %v54_v29 = vmax.f32 %v50_v28, 1e-24  ;;  %v629_v28 = vpack.c.bf16 %v306_v26, %v305_v25 }
  0xbb   :  { %666 = vrsqrt.f32 %v54_v29  ;;  %v308_v29 = vld [vmem:[#allocation5 + $0x118] sm:$0xff] }
  0xbc   :  { %v53_v30 = vpop.xlane.xlu0 %52 }
  0xbd   :  { %v55_v31 = vmax.f32 %v53_v30, 1e-24  ;;  %v632_v30 = vpack.c.bf16 %v308_v29, %v307_v27 }
  0xbf   :  { %668 = vrsqrt.f32 %v55_v31  ;;  %v309_v31 = vld [vmem:[#allocation5 + $0x120] sm:$0xff] }
  0xc0   :  { %v635_v33 = vpack.c.bf16 %v310_v32, %v309_v31 }
  0xc5   :  { %v667_v39 = vpop.eup %666 }
  0xc6   :  { %v58_v42 = vmul.f32 %v667_v39, %v802_v0  ;;  %v211_v0 = vld [vmem:[#allocation5 + $0xa0] sm:$0xff]  ;;  %v641_v39 = vpack.c.bf16 %v314_v38, %v313_v37 }
  0xc8   :  { %v65_v48 = vrot.slane %v58_v42, %v64_v43  ;;  %v644_v42 = vpack.c.bf16 %v316_v41, %v315_v40 }
  0xc9   :  { %v669_v46 = vpop.eup %668 }
  0xca   :  { %v66_v47 = vmul.f32 %v669_v46, %v804_v1  ;;  %v212_v1 = vld [vmem:[#allocation5 + $0xa8] sm:$0xff]  ;;  %v419_v46 = vld [vmem:[%s863_s2] ss:$0 sm:$0xff] }
  0xcb   :  { %v611_v2 = vpack.c.bf16 %v212_v1, %v211_v0 }
  0xcc   :  { %v73_v49 = vrot.slane %v66_v47, %v64_v43  ;;  %v317_v43 = vld [vmem:[#allocation5 + $0x160] sm:$0xff] }
  0xcd   :  { %612 = vmatpush3.bf16.msra.mxu1 %v611_v2  ;;  %v647_v45 = vpack.c.bf16 %v318_v44, %v317_v43 }
  0xce   :  { %v75_v54 = vcombine.high %v65_v48, %v73_v49  ;;  %v74_v55 = vcombine.low %v65_v48, %v73_v49  ;;  %613 = vmatprep.subr.bf16.mxu1 %v748_v9 }
  0xd0   :  { %v89_v59 = vrot.slane %v75_v54, %v81_v50  ;;  %v82_v60 = vrot.slane %v74_v55, %v81_v50  ;;  %v650_v54 = vpack.c.bf16 %v320_v53, %v319_v52  ;;  %v421_v55 = vld [vmem:[%s863_s2 + $0x1] ss:$0 sm:$0xff] }
  0xd1   :  { %615 = vmatpush3.bf16.msra.mxu1 %v614_v5 }
  0xd2   :  { %v91_v62 = vcombine.high %v89_v59, %v752_v51  ;;  %v90_v63 = vcombine.high %v82_v60, %v752_v51  ;;  %616 = vmatprep.subr.bf16.mxu1 %v748_v9 }
  0xd4   :  { %101 = vrot.lane.b32.xlu0 %v91_v62, %s753_s1  ;;  %93 = vrot.lane.b32.xlu1 %v90_v63, %s754_s12 }
  0xd5   :  { %618 = vmatpush3.bf16.msra.mxu1 %v617_v8 }
  0xd6   :  { %619 = vmatprep.subr.bf16.mxu1 %v748_v9 }
  0xd8   :  { %97 = vrot.lane.b32.xlu1 %v89_v59, %s743_s22 }
  0xd9   :  { %621 = vmatpush3.bf16.msra.mxu1 %v620_v12 }
  0xda   :  { %622 = vmatprep.subr.bf16.mxu1 %v748_v9 }
  0xdd   :  { %624 = vmatpush3.bf16.msra.mxu1 %v623_v15 }
  0xde   :  { %625 = vmatprep.subr.bf16.mxu1 %v748_v9 }
  0xe1   :  { %627 = vmatpush3.bf16.msra.mxu1 %v626_v24 }
 0x146   :  { %v94_v16 = vpop.permute.xlu1 %93  ;;  %v102_v19 = vpop.permute.xlu0 %101 }
 0x147   :  { %v105_v17 = vsel %vm104_vm2, %v82_v60, %v94_v16  ;;  %v423_v60 = vld [vmem:[%s863_s2 + $0x2] ss:$0 sm:$0xff] }
 0x14a   :  { %v98_v18 = vpop.permute.xlu1 %97 }
 0x14b   :  { %v107_v20 = vsel %vm106_vm3, %v105_v17, %v98_v18 }
 0x14c   :  { %v109_v21 = vsel %vm108_vm4, %v107_v20, %v102_v19 }
 0x14d   :  { %508 = vmatmul.mubr.f32.vlgmr.msra.gmra.mrb[0].mxu0 %v109_v21 }
 0x14e   :  { %577 = vmatprep.mubr.msk.f32.mxu0 %vm751_vm1, %v752_v51  ;;  %630 = vmatpush3.bf16.msra.mxu0 %v629_v28 }
 0x14f   :  { %631 = vmatprep.subr.bf16.mxu0 %v748_v9 }
 0x152   :  { %633 = vmatpush3.bf16.msra.mxu0 %v632_v30 }
 0x153   :  { %634 = vmatprep.subr.bf16.mxu0 %v748_v9 }
 0x156   :  { %636 = vmatpush3.bf16.msra.mxu0 %v635_v33 }
 0x157   :  { %637 = vmatprep.subr.bf16.mxu0 %v748_v9 }
 0x15a   :  { %639 = vmatpush3.bf16.msra.mxu0 %v638_v36 }
 0x15b   :  { %640 = vmatprep.subr.bf16.mxu0 %v748_v9 }
 0x15e   :  { %642 = vmatpush3.bf16.msra.mxu0 %v641_v39 }
 0x15f   :  { %643 = vmatprep.subr.bf16.mxu0 %v748_v9 }
 0x162   :  { %645 = vmatpush3.bf16.msra.mxu0 %v644_v42 }
 0x163   :  { %646 = vmatprep.subr.bf16.mxu0 %v748_v9 }
 0x166   :  { %648 = vmatpush3.bf16.msra.mxu0 %v647_v45 }
 0x167   :  { %649 = vmatprep.subr.bf16.mxu0 %v748_v9 }
 0x16a   :  { %651 = vmatpush3.bf16.msra.mxu0 %v650_v54 }
 0x220   :  { %v199_v47 = vpop.f32.mrb[0].mxu0 }
 0x221   :  { %v200_v48 = vadd.f32 %v419_v46, %v199_v47  ;;  %v509_v49 = vpop.f32.mrb[1].mxu0 }
 0x223   :  { %v204_v50 = vmul.f32 0.2, %v200_v48  ;;  %vm203_vm5 = vcmp.ge.f32.partialorder %v200_v48, 0.0 }
 0x225   :  { %v205_v51 = vsel %vm203_vm5, %v200_v48, %v204_v50 }
 0x226   :  { %543 = vmatmul.mubr.f32.vlgmr.msra.gmra.mrb[0].mxu1 %v205_v51 }
 0x2f9   :  { %v297_v9 = vpop.f32.mrb[0].mxu1 }
 0x2fa   :  { %v298_v56 = vadd.f32 %v421_v55, %v297_v9  ;;  %v544_v57 = vpop.f32.mrb[1].mxu1 }
 0x2fc   :  { %vm301_vm6 = vcmp.ge.f32.partialorder %v298_v56, 0.0  ;;  %v302_v58 = vmul.f32 0.2, %v298_v56 }
 0x2fe   :  { %v303_v59 = vsel %vm301_vm6, %v298_v56, %v302_v58 }
 0x2ff   :  { %578 = vmatmul.mubr.f32.vlgmr.msra.gmra.mrb[2].mxu0 %v303_v59 }
 0x3d2   :  { %v395_v61 = vpop.f32.mrb[2].mxu0 }
 0x3d3   :  { %v396_v62 = vadd.f32 %v423_v60, %v395_v61  ;;  %v579_v63 = vpop.f32.mrb[3].mxu0 }
 0x3d5   :  { %v400_v0 = vmul.f32 0.2, %v396_v62  ;;  %vm399_vm7 = vcmp.ge.f32.partialorder %v396_v62, 0.0 }
 0x3d7   :  { %v401_v1 = vsel %vm399_vm7, %v396_v62, %v400_v0 }
 0x3d8   :  { %402 = vst [vmem:[#allocation7] sm:$0x3] %v401_v1 }
 0x3d9   :  { %725 = shalt.err (!%p722_p6)
}
 0x3da   :  { %s726_s2 = scalar_lea.hbm %s864_s3, 32 }
 0x3db   :  { %p727_p7 = scmp.ne.s32.totalorder %s864_s3, %s726_s2  ;;  %p730_p8 = scmp.lt.u32.totalorder %s726_s2, %s864_s3 }
 0x3dd   :  { %p732_p9 = pnand %p730_p8, %p727_p7 }
 0x3df   :  { %735 = shalt.err (!%p732_p9)
}
 0x3e0   :  { %412 = dma.vmem_to_hbm [thread:$0]  %s410_s20, 32, %s864_s3, [#allocation4]  }
 0x3e1   :  { %740 = dma.done.wait [#allocation4], 32  }
 0x3e2   :  { %741 = vsyncadd [#allocation4], 4294967264 }
 0x3e3   :  { %416 = vsyncpa [#allocation3], 1 }
 0x3e4   :  { %417 = vsyncpa [#allocation6], 1 }
 0x3e5   :  { %418 = vsyncpa [#allocation4], 1 }

</bundles_post_ra>
